<compile_context>
chip_gen: v7x
topology: tpu7x:2x2x1
jax: 0.10.0
libtpu: 0.0.40
codegen_flags: <defaults>
</compile_context>

<pallas_src>
import jax
import jax.numpy as jnp
from jax.experimental import pallas as pl
from jax.experimental.pallas import tpu as pltpu


def planar_flow_kernel(zt_ref, w_ref, u_ref, scal_ref, zt_out_ref, logdet_ref):
    """One batch tile, transposed layout.

    zt_ref:     (D, TB)  z^T tile   (batch on lanes, dim on sublanes)
    w_ref:      (D, 1)   flow parameter w (column)
    u_ref:      (D, 1)   invertibility-corrected u_hat (column)
    scal_ref:   (2,)     SMEM scalars: [b, w^T u_hat]
    zt_out_ref: (D, TB)  transformed z^T tile
    logdet_ref: (1, TB)  log|det Jacobian| per sample (lane-dense row)
    """
    z = zt_ref[...]                     # (D, TB)
    w = w_ref[...]                      # (D, 1)
    u = u_ref[...]                      # (D, 1)
    b = scal_ref[0]                     # scalar (SMEM)
    wu = scal_ref[1]                    # scalar (SMEM), hoisted w^T u_hat

    # w^T z + b -> (1, TB): sublane reduction, result is lane-dense.
    # (For small D this VPU/XLU path beats an MXU dot; skip MXU per review.)
    lin = jnp.sum(z * w, axis=0, keepdims=True) + b

    t = jnp.tanh(lin)                   # h(.), EUP
    h_prime = 1.0 - t * t               # h'(x) = 1 - tanh(x)^2

    # f(z) = z + u_hat * h(w^T z + b): (D,1) broadcast over lanes.
    zt_out_ref[...] = z + u * t

    # log|det(I + u_hat psi^T)| = log|1 + h'(lin) * w^T u_hat|
    logdet_ref[...] = jnp.log(jnp.abs(1.0 + h_prime * wu) + 1e-8)


def planar_flow_forward(z, w, u, b, *, tile_b=1024):
    """z: (B, D) float32. w, u: (D,). b: scalar. Returns (z_new (B,D), log_det (B,))."""
    z = z.astype(jnp.float32)
    w = jnp.asarray(w, jnp.float32)
    u = jnp.asarray(u, jnp.float32)
    b = jnp.asarray(b, jnp.float32)
    B, D = z.shape

    # ensure_invertibility (parameter glue, plain JAX):
    #   u_hat = u + (m(w^T u) - w^T u) * w / ||w||^2, m(x) = -1 + softplus(x)
    wtu = jnp.dot(w, u)
    m_wtu = -1.0 + jax.nn.softplus(wtu)
    u_hat = u + (m_wtu - wtu) * w / (jnp.dot(w, w) + 1e-8)

    # Grid-invariant scalar hoisted out of the kernel.
    wu = jnp.dot(w, u_hat)

    # Lane-aligned batch tile: multiple of 128, large (overhead amortization),
    # capped so double-buffered in+out f32 tiles stay well inside v7x VMEM.
    vmem_cap_rows = max(128, (24 * 1024 * 1024 // (4 * 4 * max(D, 1))) // 128 * 128)
    tile = max(128, min(tile_b, vmem_cap_rows, pl.cdiv(B, 128) * 128))
    n_tiles = pl.cdiv(B, tile)
    B_pad = n_tiles * tile

    # Transposed, padded layout: batch -> lanes (lane-dense I/O), dim -> sublanes.
    z_t = jnp.pad(z, ((0, B_pad - B), (0, 0))).T            # (D, B_pad)
    w_col = w.reshape(D, 1)
    u_col = u_hat.reshape(D, 1)
    scalars = jnp.stack([b, wu]).astype(jnp.float32)         # (2,) -> SMEM

    z_new_t, log_det_row = pl.pallas_call(
        planar_flow_kernel,
        out_shape=(
            jax.ShapeDtypeStruct((D, B_pad), jnp.float32),   # z_new^T
            jax.ShapeDtypeStruct((1, B_pad), jnp.float32),   # log_det (lane-dense)
        ),
        grid_spec=pltpu.PrefetchScalarGridSpec(
            num_scalar_prefetch=0,
            grid=(n_tiles,),
            in_specs=[
                pl.BlockSpec((D, tile), lambda i: (0, i)),   # z^T tile
                pl.BlockSpec((D, 1), lambda i: (0, 0)),      # w (replicated)
                pl.BlockSpec((D, 1), lambda i: (0, 0)),      # u_hat (replicated)
                pl.BlockSpec(memory_space=pltpu.MemorySpace.SMEM),  # [b, w^T u_hat]
            ],
            out_specs=[
                pl.BlockSpec((D, tile), lambda i: (0, i)),
                pl.BlockSpec((1, tile), lambda i: (0, i)),
            ],
        ),
        input_output_aliases={0: 0},   # reuse z^T buffer for z_new^T
        compiler_params=pltpu.CompilerParams(
            dimension_semantics=("parallel",)),
    )(z_t, w_col, u_col, scalars)

    z_new = z_new_t.T[:B]              # (B, D)
    log_det = log_det_row[0, :B]       # (B,)
    return z_new, log_det


def planar_flow_reference(z, w, u, b):
    """Pure-JAX reference for correctness check."""
    wtu = jnp.dot(w, u)
    m_wtu = -1.0 + jax.nn.softplus(wtu)
    u_hat = u + (m_wtu - wtu) * w / (jnp.dot(w, w) + 1e-8)
    lin = z @ w + b                          # (B,)
    z_new = z + u_hat[None, :] * jnp.tanh(lin)[:, None]
    h_prime = 1.0 - jnp.tanh(lin) ** 2
    log_det = jnp.log(jnp.abs(1.0 + h_prime * jnp.dot(w, u_hat)) + 1e-8)
    return z_new, log_det


if __name__ == "__main__":
    key = jax.random.PRNGKey(0)
    k_z, k_w, k_u, k_b = jax.random.split(key, 4)

    B, D = 16, 16  # small shapes; dim = self.dim of PlanarFlow
    z = jax.random.normal(k_z, (B, D), dtype=jnp.float32)
    w = 0.1 * jax.random.normal(k_w, (D,), dtype=jnp.float32)
    u = 0.1 * jax.random.normal(k_u, (D,), dtype=jnp.float32)
    b = 0.1 * jax.random.normal(k_b, (), dtype=jnp.float32)

    z_new, log_det = planar_flow_forward(z, w, u, b)
    jax.block_until_ready((z_new, log_det))

    z_ref, ld_ref = planar_flow_reference(z, w, u, b)
    assert z_new.shape == (B, D) and log_det.shape == (B,)
    assert jnp.allclose(z_new, z_ref, atol=1e-5, rtol=1e-5)
    assert jnp.allclose(log_det, ld_ref, atol=1e-5, rtol=1e-5)

    # Also exercise a ragged, multi-tile batch (no divisibility requirement).
    B2 = 300
    z2 = jax.random.normal(k_z, (B2, D), dtype=jnp.float32)
    z2_new, ld2 = planar_flow_forward(z2, w, u, b, tile_b=128)
    jax.block_until_ready((z2_new, ld2))
    z2_ref, ld2_ref = planar_flow_reference(z2, w, u, b)
    assert jnp.allclose(z2_new, z2_ref, atol=1e-5, rtol=1e-5)
    assert jnp.allclose(ld2, ld2_ref, atol=1e-5, rtol=1e-5)

    print("KERNEL_OK")
</pallas_src>

<mosaic_0001>
module attributes {stable_mosaic.version = 11 : i64} {
  func.func @planar_flow_kernel(%arg0: i32, %arg1: memref<16x128xf32, #tpu.memory_space<vmem>>, %arg2: memref<16x1xf32, #tpu.memory_space<vmem>>, %arg3: memref<16x1xf32, #tpu.memory_space<vmem>>, %arg4: memref<2xf32, #tpu.memory_space<smem>>, %arg5: memref<16x128xf32, #tpu.memory_space<vmem>>, %arg6: memref<1x128xf32, #tpu.memory_space<vmem>>) attributes {dimension_semantics = [#tpu.dimension_semantics<parallel>], iteration_bounds = array<i64: 1>, scalar_prefetch = 0 : i64, scratch_operands = 0 : i64, tpu.core_type = #tpu.core_type<tc>, window_params = [{transform_indices = @transform_0, window_bounds = array<i64: 16, 128>}, {pipeline_mode = #tpu.pipeline_mode<synchronous>, transform_indices = @transform_1, window_bounds = array<i64: 16, 1>}, {pipeline_mode = #tpu.pipeline_mode<synchronous>, transform_indices = @transform_2, window_bounds = array<i64: 16, 1>}, {transform_indices = @transform_3, window_bounds = array<i64: 2>}, {transform_indices = @transform_4, window_bounds = array<i64: 16, 128>}, {transform_indices = @transform_5, window_bounds = array<i64: 1, 128>}]} {
    %c0 = arith.constant 0 : index
    %c0_0 = arith.constant 0 : index
    %0 = vector.load %arg1[%c0, %c0_0] : memref<16x128xf32, #tpu.memory_space<vmem>>, vector<16x128xf32>
    %c0_1 = arith.constant 0 : index
    %c0_2 = arith.constant 0 : index
    %1 = vector.load %arg2[%c0_1, %c0_2] : memref<16x1xf32, #tpu.memory_space<vmem>>, vector<16x1xf32>
    %c0_3 = arith.constant 0 : index
    %c0_4 = arith.constant 0 : index
    %2 = vector.load %arg3[%c0_3, %c0_4] : memref<16x1xf32, #tpu.memory_space<vmem>>, vector<16x1xf32>
    %c0_5 = arith.constant 0 : index
    %3 = memref.load %arg4[%c0_5] : memref<2xf32, #tpu.memory_space<smem>>
    %c1 = arith.constant 1 : index
    %4 = memref.load %arg4[%c1] : memref<2xf32, #tpu.memory_space<smem>>
    %5 = vector.broadcast %1 : vector<16x1xf32> to vector<16x128xf32>
    %6 = arith.mulf %0, %5 : vector<16x128xf32>
    %cst = arith.constant dense<0.000000e+00> : vector<128xf32>
    %7 = vector.multi_reduction <add>, %6, %cst [0] : vector<16x128xf32> to vector<128xf32>
    %8 = vector.shape_cast %7 : vector<128xf32> to vector<1x128xf32>
    %9 = vector.broadcast %3 : f32 to vector<1x128xf32>
    %10 = arith.addf %8, %9 : vector<1x128xf32>
    %11 = math.tanh %10 : vector<1x128xf32>
    %12 = arith.mulf %11, %11 : vector<1x128xf32>
    %cst_6 = arith.constant 1.000000e+00 : f32
    %13 = vector.broadcast %cst_6 : f32 to vector<1x128xf32>
    %14 = arith.subf %13, %12 : vector<1x128xf32>
    %15 = vector.broadcast %2 : vector<16x1xf32> to vector<16x128xf32>
    %16 = vector.broadcast %11 : vector<1x128xf32> to vector<16x128xf32>
    %17 = arith.mulf %15, %16 : vector<16x128xf32>
    %18 = arith.addf %0, %17 : vector<16x128xf32>
    %c0_7 = arith.constant 0 : index
    %c0_8 = arith.constant 0 : index
    %19 = vector.load %arg5[%c0_7, %c0_8] : memref<16x128xf32, #tpu.memory_space<vmem>>, vector<16x128xf32>
    tpu.vector_store %arg5[%c0_7, %c0_8], %18 {strides = array<i32>} : memref<16x128xf32, #tpu.memory_space<vmem>>, vector<16x128xf32>,
    %20 = vector.broadcast %4 : f32 to vector<1x128xf32>
    %21 = arith.mulf %14, %20 : vector<1x128xf32>
    %cst_9 = arith.constant 1.000000e+00 : f32
    %22 = vector.broadcast %cst_9 : f32 to vector<1x128xf32>
    %23 = arith.addf %22, %21 : vector<1x128xf32>
    %24 = math.absf %23 : vector<1x128xf32>
    %cst_10 = arith.constant 9.99999993E-9 : f32
    %25 = vector.broadcast %cst_10 : f32 to vector<1x128xf32>
    %26 = arith.addf %24, %25 : vector<1x128xf32>
    %27 = math.log %26 : vector<1x128xf32>
    %c0_11 = arith.constant 0 : index
    %c0_12 = arith.constant 0 : index
    %28 = vector.load %arg6[%c0_11, %c0_12] : memref<1x128xf32, #tpu.memory_space<vmem>>, vector<1x128xf32>
    tpu.vector_store %arg6[%c0_11, %c0_12], %27 {strides = array<i32>} : memref<1x128xf32, #tpu.memory_space<vmem>>, vector<1x128xf32>,
    return
  }
  func.func @transform_0(%arg0: i32) -> (i32, i32) {
    %c0_i32 = arith.constant 0 : i32
    %c0_i32_0 = arith.constant 0 : i32
    return %c0_i32, %arg0 : i32, i32
  }
  func.func @transform_1(%arg0: i32) -> (i32, i32) {
    %c0_i32 = arith.constant 0 : i32
    %c0_i32_0 = arith.constant 0 : i32
    %c0_i32_1 = arith.constant 0 : i32
    return %c0_i32, %c0_i32_0 : i32, i32
  }
  func.func @transform_2(%arg0: i32) -> (i32, i32) {
    %c0_i32 = arith.constant 0 : i32
    %c0_i32_0 = arith.constant 0 : i32
    %c0_i32_1 = arith.constant 0 : i32
    return %c0_i32, %c0_i32_0 : i32, i32
  }
  func.func @transform_3(%arg0: i32) -> i32 {
    %c0_i32 = arith.constant 0 : i32
    %c0_i32_0 = arith.constant 0 : i32
    return %c0_i32 : i32
  }
  func.func @transform_4(%arg0: i32) -> (i32, i32) {
    %c0_i32 = arith.constant 0 : i32
    %c0_i32_0 = arith.constant 0 : i32
    return %c0_i32, %arg0 : i32, i32
  }
  func.func @transform_5(%arg0: i32) -> (i32, i32) {
    %c0_i32 = arith.constant 0 : i32
    %c0_i32_0 = arith.constant 0 : i32
    return %c0_i32, %arg0 : i32, i32
  }
}

</mosaic_0001>

<bundles_post_ra>
// kernel: tpu_custom_call.1
= control target key start
LH: loop header
LB: loop body
LE: loop exit
PB: predicated region body
PF: predicated region fallthrough
CT: control target
= control target key end

     0   :  { %11 = vsyncpa [#allocation3], 0  ;;  %s330_s0 = inlined_call_operand.hbm [shape: f32[16,128], index: 0, kind: input, shape index: {}, may-alias: {0,4}]   ;;  %s331_s1 = inlined_call_operand.vmem [shape: f32[16,1], index: 1, kind: input, shape index: {}]   ;;  %s332_s2 = inlined_call_operand.vmem [shape: f32[16,1], index: 2, kind: input, shape index: {}]   ;;  %s333_s3 = inlined_call_operand.vmem [shape: f32[2], index: 3, kind: input, shape index: {}]   ;;  %s334_s4 = inlined_call_operand.hbm [shape: f32[16,128], index: 4, kind: output, shape index: {0}, may-alias: {0,4}]   ;;  %s335_s5 = inlined_call_operand.hbm [shape: f32[1,128], index: 5, kind: output, shape index: {1}]  }
   0x1   :  { %12 = vsyncpa [#allocation5], 0 }
   0x2   :  { %13 = vsyncpa [#allocation4], 0 }
   0x3   :  { %14 = vsyncpa [#allocation9], 0  ;;  %s236_s18 = smov [#allocation2]   ;;  %s37_s22 = sshll.u32 %s333_s3, 4  ;;  %s38_s22 = int_to_ptr.vmem [resolvable:$true] %s37_s22 }
   0x4   :  { %s20_s19 = sshll.u32 %s236_s18, 4  ;;  %s150_s25 = scalar_lea.hbm %s330_s0, 256  ;;  %s21_s19 = int_to_ptr.vmem [resolvable:$true] %s20_s19 }
   0x5   :  { %p151_p0 = scmp.ne.s32.totalorder %s330_s0, %s150_s25  ;;  %p154_p1 = scmp.lt.u32.totalorder %s150_s25, %s330_s0 }
   0x7   :  { %p156_p2 = pnand %p154_p1, %p151_p0 }
   0x9   :  { %159 = shalt.err (!%p156_p2)
}
   0xa   :  { %s160_s30 = scalar_lea.vmem %s21_s19, 256  ;;  %p165_p4 = scmp.lt.s32.totalorder %s21_s19, %s21_s19 }
   0xb   :  { %p161_p3 = scmp.ne.s32.totalorder %s21_s19, %s160_s30  ;;  %p166_p5 = scmp.lt.s32.totalorder %s160_s30, %s160_s30 }
   0xd   :  { %p167_p6 = por %p166_p5, %p165_p4 }
   0xf   :  { %p168_p7 = pnand %p167_p6, %p161_p3 }
  0x11   :  { %171 = shalt.err (!%p168_p7)
}
  0x12   :  { %s237_s3 = smov 128   ;;  %s238_s6 = smov 8  }
  0x13   :  { %26 = dma.hbm_to_vmem [thread:$0]  %s330_s0, 256, %s21_s19, [#allocation3], %s237_s3, %s237_s3, %s238_s6  }
  0x14   :  { %s172_s9 = scalar_lea.vmem %s38_s22, 16  ;;  %p177_p9 = scmp.lt.s32.totalorder %s38_s22, %s38_s22 }
  0x15   :  { %p173_p8 = scmp.ne.s32.totalorder %s38_s22, %s172_s9  ;;  %p178_p10 = scmp.lt.s32.totalorder %s172_s9, %s172_s9 }
  0x17   :  { %p179_p11 = por %p178_p10, %p177_p9 }
  0x19   :  { %p180_p12 = pnand %p179_p11, %p173_p8 }
  0x1b   :  { %183 = shalt.err (!%p180_p12)
}
  0x1c   :  { %s239_s10 = smov [#allocation6]  }
  0x1d   :  { %40 = dma.vmem_to_smem %s38_s22, 16, %s239_s10, [#allocation5]  }
  0x1e   :  { %228 = dma.done.wait [#allocation3], 256  }
  0x1f   :  { %229 = vsyncadd [#allocation3], 4294967040 }
  0x20   :  { %230 = dma.done.wait [#allocation5], 16  }
  0x21   :  { %231 = vsyncadd [#allocation5], 4294967280 }
  0x22   :  { %47 = sfence }
  0x23   :  { %v50_v0 = vld [vmem:[%s331_s1] sm:$0xff]  ;;  %v240_v2 = vmov 0   ;;  %v51_v3 = vld [vmem:[%s331_s1 + $0x8] sm:$0xff]  ;;  %s54_s18 = sld [smem:[#allocation6]]  ;;  %s136_s1 = sld [smem:[#allocation6 + $0x1]] }
  0x24   :  { %v52_v1 = vld [vmem:[%s332_s2] sm:$0xff]  ;;  %144 = vset.pattern.permute.xlu0 %v240_v2  ;;  %145 = vset.pattern.permute.xlu1 %v240_v2  ;;  %v53_v4 = vld [vmem:[%s332_s2 + $0x8] sm:$0xff]  ;;  %s241_s2 = smov [#allocation7]  }
  0x25   :  { %58 = vperm.xlu0 %144, %v50_v0   ;;  %82 = vperm.xlu1 %145, %v52_v1   ;;  %v48_v6 = vld [vmem:[#allocation2] sm:$0xff]  ;;  %v49_v7 = vld [vmem:[#allocation2 + $0x8] sm:$0xff]  ;;  %s109_s19 = sshll.u32 %s241_s2, 4  ;;  %s110_s19 = int_to_ptr.vmem [resolvable:$true] %s109_s19 }
  0x26   :  { %s184_s20 = scalar_lea.vmem %s110_s19, 256  ;;  %p189_p0 = scmp.lt.s32.totalorder %s110_s19, %s110_s19 }
  0x27   :  { %p185_p13 = scmp.ne.s32.totalorder %s110_s19, %s184_s20  ;;  %p190_p1 = scmp.lt.s32.totalorder %s184_s20, %s184_s20 }
  0x29   :  { %63 = vperm.xlu0 %144, %v51_v3   ;;  %87 = vperm.xlu1 %145, %v53_v4   ;;  %v75_v17 = vstv %s54_s18  ;;  %v96_v26 = vstv %s136_s1  ;;  %p191_p2 = por %p190_p1, %p189_p0 }
  0x2b   :  { %p192_p3 = pnand %p191_p2, %p185_p13 }
  0xa4   :  { %v59_v5 = vpop.permute.xlu0 %58  ;;  %v83_v20 = vpop.permute.xlu1 %82 }
  0xa5   :  { %v66_v9 = vmul.f32 %v59_v5, %v48_v6 }
  0xa8   :  { %v64_v8 = vpop.permute.xlu0 %63  ;;  %v88_v21 = vpop.permute.xlu1 %87 }
  0xa9   :  { %v67_v10 = vmul.f32 %v64_v8, %v49_v7 }
  0xab   :  { %v68_v11 = vadd.f32 %v67_v10, %v66_v9 }
  0xad   :  { %v69_v12 = vrot.slane %v68_v11, 4 }
  0xaf   :  { %v70_v13 = vadd.f32 %v69_v12, %v68_v11 }
  0xb1   :  { %v71_v14 = vrot.slane %v70_v13, 2 }
  0xb3   :  { %v72_v15 = vadd.f32 %v71_v14, %v70_v13 }
  0xb5   :  { %v73_v16 = vrot.slane %v72_v15, 1 }
  0xb7   :  { %v74_v18 = vadd.f32 %v73_v16, %v72_v15 }
  0xb9   :  { %v76_v19 = vadd.f32 %v75_v17, %v74_v18 }
  0xbb   :  { %146 = vtanh.f32 %v76_v19 }
  0xc5   :  { %v147_v22 = vpop.eup %146 }
  0xc6   :  { %v90_v23 = vmul.f32 %v147_v22, %v83_v20  ;;  %v91_v24 = vmul.f32 %v147_v22, %v88_v21  ;;  %v78_v25 = vmul.f32 %v147_v22, %v147_v22 }
  0xc8   :  { %v92_v27 = vadd.f32 %v90_v23, %v48_v6  ;;  %v93_v28 = vadd.f32 %v91_v24, %v49_v7  ;;  %v79_v29 = vsub.f32 1.0, %v78_v25 }
  0xca   :  { %94 = vst [vmem:[#allocation7] sm:$0xff] %v92_v27  ;;  %95 = vst [vmem:[#allocation7 + $0x8] sm:$0xff] %v93_v28  ;;  %v97_v30 = vmul.f32 %v96_v26, %v79_v29 }
  0xcb   :  { %195 = shalt.err (!%p192_p3)
}
  0xcc   :  { %s196_s23 = scalar_lea.hbm %s334_s4, 256 }
  0xcd   :  { %p197_p4 = scmp.ne.s32.totalorder %s334_s4, %s196_s23  ;;  %p200_p5 = scmp.lt.u32.totalorder %s196_s23, %s334_s4 }
  0xcf   :  { %p202_p6 = pnand %p200_p5, %p197_p4 }
  0xd1   :  { %205 = shalt.err (!%p202_p6)
}
  0xd2   :  { %115 = dma.vmem_to_hbm [thread:$0]  %s110_s19, 256, %s334_s4, [#allocation4], %s237_s3, %s237_s3, %s238_s6   ;;  %v98_v31 = vadd.f32 1.0, %v97_v30 }
  0xd3   :  { %s242_s30 = smov [#allocation8]  }
  0xd4   :  { %v99_v32 = vand.u32 2147483647, %v98_v31  ;;  %s122_s7 = sshll.u32 %s242_s30, 4  ;;  %s123_s7 = int_to_ptr.vmem [resolvable:$true] %s122_s7 }
  0xd5   :  { %s206_s8 = scalar_lea.vmem %s123_s7, 16  ;;  %s210_s9 = scalar_lea.vmem %s123_s7, 32 }
  0xd6   :  { %v100_v33 = vadd.f32 1e-08, %v99_v32  ;;  %p207_p7 = scmp.ne.s32.totalorder %s123_s7, %s206_s8  ;;  %p211_p8 = scmp.lt.s32.totalorder %s123_s7, %s123_s7 }
  0xd7   :  { %p212_p9 = scmp.lt.s32.totalorder %s210_s9, %s206_s8 }
  0xd8   :  { %148 = vlog2.f32 %v100_v33 }
  0xd9   :  { %p213_p10 = por %p212_p9, %p211_p8 }
  0xdb   :  { %p214_p11 = pnand %p213_p10, %p207_p7 }
  0xe2   :  { %v149_v34 = vpop.eup %148 }
  0xe3   :  { %v102_v35 = vmul.f32 0.6931472, %v149_v34 }
  0xe5   :  { %103 = vst [vmem:[#allocation8] sm:$0x1] %v102_v35 }
  0xe6   :  { %217 = shalt.err (!%p214_p11)
}
  0xe7   :  { %s218_s3 = scalar_lea.hbm %s335_s5, 16 }
  0xe8   :  { %p219_p12 = scmp.ne.s32.totalorder %s335_s5, %s218_s3  ;;  %p222_p13 = scmp.lt.u32.totalorder %s218_s3, %s335_s5 }
  0xea   :  { %p224_p0 = pnand %p222_p13, %p219_p12 }
  0xec   :  { %227 = shalt.err (!%p224_p0)
}
  0xed   :  { %125 = dma.vmem_to_hbm [thread:$0]  %s123_s7, 16, %s335_s5, [#allocation9]  }
  0xee   :  { %232 = dma.done.wait [#allocation4], 256  }
  0xef   :  { %233 = vsyncadd [#allocation4], 4294967040 }
  0xf0   :  { %234 = dma.done.wait [#allocation9], 16  }
  0xf1   :  { %235 = vsyncadd [#allocation9], 4294967280 }
  0xf2   :  { %132 = vsyncpa [#allocation3], 1 }
  0xf3   :  { %133 = vsyncpa [#allocation4], 1 }
  0xf4   :  { %134 = vsyncpa [#allocation9], 1 }
  0xf5   :  { %135 = vsyncpa [#allocation5], 1 }

</bundles_post_ra>
